<compile_context>
chip_gen: v6e
topology: v6e:2x2x1
jax: 0.10.0
libtpu: 0.0.40
codegen_flags: <defaults>
</compile_context>

<pallas_src>
import jax
import jax.numpy as jnp
from jax.experimental import pallas as pl
from jax.experimental.pallas import tpu as pltpu

D_IN, HID, EMB = 32, 64, 32
EPS = 1e-6  # matches torch.nn.functional.pairwise_distance default eps


# ----------------------------- fused kernel --------------------------------

def tripletnet_kernel(xyz_ref, w1_ref, b1_ref, wml_ref, bml_ref,
                      latent_ref, ml_ref, dist_ref):
    """Fused triplet forward.

    xyz_ref   : (3B, D_IN)     stacked [x; y; z]
    w1_ref    : (D_IN, HID)    b1_ref : (1, HID)
    wml_ref   : (HID, 2*EMB)   packed [Wm | Wv]
    bml_ref   : (1, 2*EMB)     packed [bm | bv]
    latent_ref: (3B, EMB)      stacked latents
    ml_ref    : (3B, 2*EMB)    stacked [mean | logvar]
    dist_ref  : (B, 2)         column 0 = dist_a, column 1 = dist_b
    """
    xyz = xyz_ref[...]

    # Layer 1: one matmul over all three branches at once.
    h = jnp.dot(xyz, w1_ref[...], preferred_element_type=jnp.float32) + b1_ref[...]
    h = jnp.maximum(h, 0.0)

    # Layer 2: mean and logvar from a single lane-wider matmul.
    ml = jnp.dot(h, wml_ref[...], preferred_element_type=jnp.float32) + bml_ref[...]
    mean = ml[:, :EMB]
    logvar = ml[:, EMB:]

    # TODO(synk): reference embeddingnet is unspecified; reparameterization uses
    # no random noise so the forward stays deterministic.
    latent = mean + jnp.exp(0.5 * logvar)

    ml_ref[...] = ml
    latent_ref[...] = latent

    # Pairwise L2 distances on the mean embeddings (torch semantics: eps added
    # to the difference before the norm).
    b = mean.shape[0] // 3
    mx = mean[:b, :]
    my = mean[b:2 * b, :]
    mz = mean[2 * b:, :]
    da = jnp.sqrt(jnp.sum((mx - my + EPS) ** 2, axis=-1, keepdims=True))
    db = jnp.sqrt(jnp.sum((mx - mz + EPS) ** 2, axis=-1, keepdims=True))
    dist_ref[...] = jnp.concatenate([da, db], axis=-1)


# ----------------------------- wrapper --------------------------------------

def tripletnet_forward(x, y, z, params):
    """Returns the same 11-tuple as the PyTorch Tripletnet.forward."""
    w1, b1, wm, bm, wv, bv = params
    B = x.shape[0]

    # Stack activations and pack mean/logvar weights (cheap host-side XLA ops).
    xyz = jnp.concatenate([x, y, z], axis=0)            # (3B, D_IN)
    wml = jnp.concatenate([wm, wv], axis=1)             # (HID, 2*EMB)
    bml = jnp.concatenate([bm, bv], axis=1)             # (1, 2*EMB)

    vmem = pl.BlockSpec(memory_space=pltpu.MemorySpace.VMEM)

    latent, ml, dists = pl.pallas_call(
        tripletnet_kernel,
        in_specs=[vmem, vmem, vmem, vmem, vmem],
        out_specs=(vmem, vmem, vmem),
        out_shape=(
            jax.ShapeDtypeStruct((3 * B, EMB), jnp.float32),      # latent
            jax.ShapeDtypeStruct((3 * B, 2 * EMB), jnp.float32),  # mean | logvar
            jax.ShapeDtypeStruct((B, 2), jnp.float32),            # dist_a, dist_b
        ),
    )(xyz, w1, b1, wml, bml)

    latent_x, latent_y, latent_z = latent[:B], latent[B:2 * B], latent[2 * B:]
    mean_x, logvar_x = ml[:B, :EMB], ml[:B, EMB:]
    mean_y, logvar_y = ml[B:2 * B, :EMB], ml[B:2 * B, EMB:]
    mean_z, logvar_z = ml[2 * B:, :EMB], ml[2 * B:, EMB:]
    dist_a, dist_b = dists[:, 0], dists[:, 1]

    return (latent_x, mean_x, logvar_x,
            latent_y, mean_y, logvar_y,
            latent_z, mean_z, logvar_z,
            dist_a, dist_b)


# ----------------------------- main ----------------------------------------

if __name__ == "__main__":
    key = jax.random.PRNGKey(0)
    kx, ky, kz, k1, k2, k3 = jax.random.split(key, 6)

    B = 8
    x = jax.random.normal(kx, (B, D_IN), dtype=jnp.float32)
    y = jax.random.normal(ky, (B, D_IN), dtype=jnp.float32)
    z = jax.random.normal(kz, (B, D_IN), dtype=jnp.float32)

    # Deterministic parameter init (synthetic embeddingnet weights).
    w1 = jax.random.normal(k1, (D_IN, HID), dtype=jnp.float32) * (1.0 / jnp.sqrt(D_IN))
    b1 = jnp.zeros((1, HID), dtype=jnp.float32)
    wm = jax.random.normal(k2, (HID, EMB), dtype=jnp.float32) * (1.0 / jnp.sqrt(HID))
    bm = jnp.zeros((1, EMB), dtype=jnp.float32)
    wv = jax.random.normal(k3, (HID, EMB), dtype=jnp.float32) * (1.0 / jnp.sqrt(HID))
    bv = jnp.zeros((1, EMB), dtype=jnp.float32)
    params = (w1, b1, wm, bm, wv, bv)

    outs = tripletnet_forward(x, y, z, params)
    outs = jax.block_until_ready(outs)

    # Sanity checks against a pure-JAX reference.
    def ref_embed(a):
        h = jnp.maximum(a @ w1 + b1, 0.0)
        mean = h @ wm + bm
        logvar = h @ wv + bv
        return mean + jnp.exp(0.5 * logvar), mean, logvar

    lx_ref, mx_ref, vx_ref = ref_embed(x)
    ly_ref, my_ref, vy_ref = ref_embed(y)
    lz_ref, mz_ref, vz_ref = ref_embed(z)
    da_ref = jnp.sqrt(jnp.sum((mx_ref - my_ref + EPS) ** 2, axis=-1))
    db_ref = jnp.sqrt(jnp.sum((mx_ref - mz_ref + EPS) ** 2, axis=-1))

    (latent_x, mean_x, logvar_x,
     latent_y, mean_y, logvar_y,
     latent_z, mean_z, logvar_z,
     dist_a, dist_b) = outs

    assert mean_x.shape == (B, EMB) and dist_a.shape == (B,) and dist_b.shape == (B,)
    for got, want in [(latent_x, lx_ref), (mean_x, mx_ref), (logvar_x, vx_ref),
                      (latent_y, ly_ref), (mean_y, my_ref), (logvar_y, vy_ref),
                      (latent_z, lz_ref), (mean_z, mz_ref), (logvar_z, vz_ref),
                      (dist_a, da_ref), (dist_b, db_ref)]:
        assert jnp.allclose(got, want, atol=1e-4, rtol=1e-4)

    print("KERNEL_OK")
</pallas_src>

<mosaic_0001>
module attributes {stable_mosaic.version = 11 : i64} {
  func.func @tripletnet_kernel(%arg0: memref<24x32xf32, #tpu.memory_space<vmem>>, %arg1: memref<32x64xf32, #tpu.memory_space<vmem>>, %arg2: memref<1x64xf32, #tpu.memory_space<vmem>>, %arg3: memref<64x64xf32, #tpu.memory_space<vmem>>, %arg4: memref<1x64xf32, #tpu.memory_space<vmem>>, %arg5: memref<24x32xf32, #tpu.memory_space<vmem>>, %arg6: memref<24x64xf32, #tpu.memory_space<vmem>>, %arg7: memref<8x2xf32, #tpu.memory_space<vmem>>) attributes {dimension_semantics = [], scalar_prefetch = 0 : i64, scratch_operands = 0 : i64, tpu.core_type = #tpu.core_type<tc>} {
    %c0 = arith.constant 0 : index
    %c0_0 = arith.constant 0 : index
    %0 = vector.load %arg0[%c0, %c0_0] : memref<24x32xf32, #tpu.memory_space<vmem>>, vector<24x32xf32>
    %c0_1 = arith.constant 0 : index
    %c0_2 = arith.constant 0 : index
    %1 = vector.load %arg1[%c0_1, %c0_2] : memref<32x64xf32, #tpu.memory_space<vmem>>, vector<32x64xf32>
    %cst = arith.constant dense<0.000000e+00> : vector<24x64xf32>
    %2 = tpu.matmul %0, %1, %cst {dimension_numbers = #tpu.dot_dimension_numbers<[1], [0], [0], [1], [0, 0, 1, 1], [], []>} : vector<24x32xf32>, vector<32x64xf32>, vector<24x64xf32> -> vector<24x64xf32>
    %c0_3 = arith.constant 0 : index
    %c0_4 = arith.constant 0 : index
    %3 = vector.load %arg2[%c0_3, %c0_4] : memref<1x64xf32, #tpu.memory_space<vmem>>, vector<1x64xf32>
    %4 = vector.broadcast %3 : vector<1x64xf32> to vector<24x64xf32>
    %5 = arith.addf %2, %4 : vector<24x64xf32>
    %cst_5 = arith.constant 0.000000e+00 : f32
    %6 = vector.broadcast %cst_5 : f32 to vector<24x64xf32>
    %7 = arith.maximumf %5, %6 : vector<24x64xf32>
    %c0_6 = arith.constant 0 : index
    %c0_7 = arith.constant 0 : index
    %8 = vector.load %arg3[%c0_6, %c0_7] : memref<64x64xf32, #tpu.memory_space<vmem>>, vector<64x64xf32>
    %cst_8 = arith.constant dense<0.000000e+00> : vector<24x64xf32>
    %9 = tpu.matmul %7, %8, %cst_8 {dimension_numbers = #tpu.dot_dimension_numbers<[1], [0], [0], [1], [0, 0, 1, 1], [], []>} : vector<24x64xf32>, vector<64x64xf32>, vector<24x64xf32> -> vector<24x64xf32>
    %c0_9 = arith.constant 0 : index
    %c0_10 = arith.constant 0 : index
    %10 = vector.load %arg4[%c0_9, %c0_10] : memref<1x64xf32, #tpu.memory_space<vmem>>, vector<1x64xf32>
    %11 = vector.broadcast %10 : vector<1x64xf32> to vector<24x64xf32>
    %12 = arith.addf %9, %11 : vector<24x64xf32>
    %13 = vector.extract_strided_slice %12 {offsets = [0, 0], sizes = [24, 32], strides = [1, 1]} : vector<24x64xf32> to vector<24x32xf32>
    %14 = vector.extract_strided_slice %12 {offsets = [0, 32], sizes = [24, 32], strides = [1, 1]} : vector<24x64xf32> to vector<24x32xf32>
    %cst_11 = arith.constant 5.000000e-01 : f32
    %15 = vector.broadcast %cst_11 : f32 to vector<24x32xf32>
    %16 = arith.mulf %15, %14 : vector<24x32xf32>
    %17 = math.exp %16 : vector<24x32xf32>
    %18 = arith.addf %13, %17 : vector<24x32xf32>
    %c0_12 = arith.constant 0 : index
    %c0_13 = arith.constant 0 : index
    %19 = vector.load %arg6[%c0_12, %c0_13] : memref<24x64xf32, #tpu.memory_space<vmem>>, vector<24x64xf32>
    tpu.vector_store %arg6[%c0_12, %c0_13], %12 {strides = array<i32>} : memref<24x64xf32, #tpu.memory_space<vmem>>, vector<24x64xf32>,
    %c0_14 = arith.constant 0 : index
    %c0_15 = arith.constant 0 : index
    %20 = vector.load %arg5[%c0_14, %c0_15] : memref<24x32xf32, #tpu.memory_space<vmem>>, vector<24x32xf32>
    tpu.vector_store %arg5[%c0_14, %c0_15], %18 {strides = array<i32>} : memref<24x32xf32, #tpu.memory_space<vmem>>, vector<24x32xf32>,
    %21 = vector.extract_strided_slice %13 {offsets = [0, 0], sizes = [8, 32], strides = [1, 1]} : vector<24x32xf32> to vector<8x32xf32>
    %22 = vector.extract_strided_slice %13 {offsets = [8, 0], sizes = [8, 32], strides = [1, 1]} : vector<24x32xf32> to vector<8x32xf32>
    %23 = vector.extract_strided_slice %13 {offsets = [16, 0], sizes = [8, 32], strides = [1, 1]} : vector<24x32xf32> to vector<8x32xf32>
    %24 = arith.subf %21, %22 : vector<8x32xf32>
    %cst_16 = arith.constant 9.99999997E-7 : f32
    %25 = vector.broadcast %cst_16 : f32 to vector<8x32xf32>
    %26 = arith.addf %24, %25 : vector<8x32xf32>
    %27 = arith.mulf %26, %26 : vector<8x32xf32>
    %cst_17 = arith.constant dense<0.000000e+00> : vector<8xf32>
    %28 = vector.multi_reduction <add>, %27, %cst_17 [1] : vector<8x32xf32> to vector<8xf32>
    %29 = vector.shape_cast %28 : vector<8xf32> to vector<8x1xf32>
    %30 = math.sqrt %29 : vector<8x1xf32>
    %31 = arith.subf %21, %23 : vector<8x32xf32>
    %cst_18 = arith.constant 9.99999997E-7 : f32
    %32 = vector.broadcast %cst_18 : f32 to vector<8x32xf32>
    %33 = arith.addf %31, %32 : vector<8x32xf32>
    %34 = arith.mulf %33, %33 : vector<8x32xf32>
    %cst_19 = arith.constant dense<0.000000e+00> : vector<8xf32>
    %35 = vector.multi_reduction <add>, %34, %cst_19 [1] : vector<8x32xf32> to vector<8xf32>
    %36 = vector.shape_cast %35 : vector<8xf32> to vector<8x1xf32>
    %37 = math.sqrt %36 : vector<8x1xf32>
    %38 = tpu.concatenate %30, %37 in 1 : vector<8x1xf32>, vector<8x1xf32> -> vector<8x2xf32>
    %c0_20 = arith.constant 0 : index
    %c0_21 = arith.constant 0 : index
    %39 = vector.load %arg7[%c0_20, %c0_21] : memref<8x2xf32, #tpu.memory_space<vmem>>, vector<8x2xf32>
    tpu.vector_store %arg7[%c0_20, %c0_21], %38 {strides = array<i32>} : memref<8x2xf32, #tpu.memory_space<vmem>>, vector<8x2xf32>,
    return
  }
}

</mosaic_0001>

<bundles_post_ra>
// kernel: tpu_custom_call.1
= control target key start
LH: loop header
LB: loop body
LE: loop exit
PB: predicated region body
PF: predicated region fallthrough
CT: control target
= control target key end

     0   :  { %13 = vsyncpa [#allocation3], 0  ;;  %s699_s0 = inlined_call_operand.hbm [shape: f32[24,32], index: 0, kind: input, shape index: {}]   ;;  %s700_s1 = inlined_call_operand.hbm [shape: f32[32,64], index: 1, kind: input, shape index: {}]   ;;  %s701_s2 = inlined_call_operand.vmem [shape: f32[1,64], index: 2, kind: input, shape index: {}]   ;;  %s702_s3 = inlined_call_operand.hbm [shape: f32[64,64], index: 3, kind: input, shape index: {}]   ;;  %s703_s4 = inlined_call_operand.vmem [shape: f32[1,64], index: 4, kind: input, shape index: {}]   ;;  %s704_s5 = inlined_call_operand.hbm [shape: f32[24,32], index: 5, kind: output, shape index: {0}]   ;;  %s705_s6 = inlined_call_operand.hbm [shape: f32[24,64], index: 6, kind: output, shape index: {1}]   ;;  %s706_s7 = inlined_call_operand.vmem [shape: f32[8,2], index: 7, kind: output, shape index: {2}]  }
   0x1   :  { %14 = vsyncpa [#allocation6], 0 }
   0x2   :  { %15 = vsyncpa [#allocation4], 0 }
   0x3   :  { %16 = vsyncpa [#allocation10], 0  ;;  %s572_s24 = smov [#allocation5]   ;;  %s573_s26 = smov [#allocation2]  }
   0x4   :  { %s34_s25 = sshll.u32 %s572_s24, 4  ;;  %s22_s27 = sshll.u32 %s573_s26, 4  ;;  %s35_s25 = int_to_ptr.vmem [resolvable:$true] %s34_s25  ;;  %s23_s27 = int_to_ptr.vmem [resolvable:$true] %s22_s27 }
   0x5   :  { %s472_s28 = scalar_lea.vmem %s35_s25, 512  ;;  %p477_p1 = scmp.lt.s32.totalorder %s35_s25, %s35_s25 }
   0x6   :  { %p473_p0 = scmp.ne.s32.totalorder %s35_s25, %s472_s28  ;;  %p478_p2 = scmp.lt.s32.totalorder %s472_s28, %s472_s28 }
   0x8   :  { %p479_p3 = por %p478_p2, %p477_p1 }
   0xa   :  { %p480_p4 = pnand %p479_p3, %p473_p0 }
   0xc   :  { %483 = shalt.err (!%p480_p4)
}
   0xd   :  { %s574_s29 = smov 128   ;;  %s575_s30 = smov 8  }
   0xe   :  { %40 = dma.hbm_to_vmem [thread:$0]  %s700_s1, 512, %s35_s25, [#allocation6], %s574_s29, %s574_s29, %s575_s30  }
   0xf   :  { %s492_s10 = scalar_lea.vmem %s23_s27, 384  ;;  %p497_p6 = scmp.lt.s32.totalorder %s23_s27, %s23_s27 }
  0x10   :  { %p493_p5 = scmp.ne.s32.totalorder %s23_s27, %s492_s10  ;;  %p498_p7 = scmp.lt.s32.totalorder %s492_s10, %s492_s10 }
  0x12   :  { %p499_p8 = por %p498_p7, %p497_p6 }
  0x14   :  { %p500_p9 = pnand %p499_p8, %p493_p5 }
  0x16   :  { %503 = shalt.err (!%p500_p9)
}
  0x17   :  { %28 = dma.hbm_to_vmem [thread:$0]  %s699_s0, 384, %s23_s27, [#allocation3], %s574_s29, %s574_s29, %s575_s30  }
  0x18   :  { %s576_s13 = smov [#allocation7]  }
  0x19   :  { %s48_s14 = sshll.u32 %s576_s13, 4  ;;  %s49_s14 = int_to_ptr.vmem [resolvable:$true] %s48_s14 }
  0x1a   :  { %s512_s15 = scalar_lea.vmem %s49_s14, 1024  ;;  %p517_p11 = scmp.lt.s32.totalorder %s49_s14, %s49_s14 }
  0x1b   :  { %p513_p10 = scmp.ne.s32.totalorder %s49_s14, %s512_s15  ;;  %p518_p12 = scmp.lt.s32.totalorder %s512_s15, %s512_s15 }
  0x1d   :  { %p519_p13 = por %p518_p12, %p517_p11 }
  0x1f   :  { %p520_p0 = pnand %p519_p13, %p513_p10 }
  0x21   :  { %523 = shalt.err (!%p520_p0)
}
  0x22   :  { %54 = dma.hbm_to_vmem [thread:$0]  %s702_s3, 1024, %s49_s14, [#allocation6], %s574_s29, %s574_s29, %s575_s30  }
  0x23   :  { %564 = dma.done.wait [#allocation3], 384  }
  0x24   :  { %565 = vsyncadd [#allocation3], 4294966912 }
  0x25   :  { %566 = dma.done.wait [#allocation6], 1536  }
  0x26   :  { %567 = vsyncadd [#allocation6], 4294965760  ;;  %v577_v0 = vmov 0.0   ;;  %vm578_vm0 = vmmov 0   ;;  %v72_v1 = vld [vmem:[#allocation5 + $0x18] sm:$0xff]  ;;  %v71_v2 = vld [vmem:[#allocation5 + $0x10] sm:$0xff] }
  0x27   :  { %402 = vmatprep.subr.mxu0 %v577_v0  ;;  %410 = vmatprep.mubr.msk.f32.mxu0 %vm578_vm0, %v577_v0  ;;  %v70_v3 = vld [vmem:[#allocation5 + $0x8] sm:$0xff]  ;;  %v180_v4 = vld [vmem:[#allocation7 + $0x38] sm:$0xff]  ;;  %v179_v5 = vld [vmem:[#allocation7 + $0x30] sm:$0xff]  ;;  %vm80_vm1 = vcmask 261120   ;;  %vm188_vm2 = vcmask 523264   ;;  %s580_s18 = smov [#allocation9]  }
  0x28   :  { %419 = vmatprep.subr.mxu1 %v577_v0  ;;  %435 = vmatprep.mubr.msk.f32.mxu1 %vm578_vm0, %v577_v0  ;;  %v69_v6 = vld [vmem:[#allocation5] sm:$0xff]  ;;  %v178_v7 = vld [vmem:[#allocation7 + $0x28] sm:$0xff]  ;;  %v176_v10 = vld [vmem:[#allocation7 + $0x18] sm:$0xff]  ;;  %s355_s19 = sshll.u32 %s580_s18, 4  ;;  %s356_s19 = int_to_ptr.vmem [resolvable:$true] %s355_s19 }
  0x29   :  { %403 = vmatpush3.msra.mxu0 %v72_v1  ;;  %420 = vmatpush3.msra.mxu1 %v180_v4  ;;  %v66_v8 = vld [vmem:[#allocation2] sm:$0xff]  ;;  %v177_v9 = vld [vmem:[#allocation7 + $0x20] sm:$0xff]  ;;  %v67_v11 = vld [vmem:[#allocation2 + $0x8] sm:$0xff]  ;;  %s524_s20 = scalar_lea.vmem %s356_s19, 384  ;;  %p529_p2 = scmp.lt.s32.totalorder %s356_s19, %s356_s19 }
  0x2a   :  { %404 = vmatprep.subr.mxu0 %v577_v0  ;;  %421 = vmatprep.subr.mxu1 %v577_v0  ;;  %v68_v12 = vld [vmem:[#allocation2 + $0x10] sm:$0xff]  ;;  %v175_v13 = vld [vmem:[#allocation7 + $0x10] sm:$0xff]  ;;  %v174_v14 = vld [vmem:[#allocation7 + $0x8] sm:$0xff]  ;;  %p525_p1 = scmp.ne.s32.totalorder %s356_s19, %s524_s20  ;;  %p530_p3 = scmp.lt.s32.totalorder %s524_s20, %s524_s20 }
  0x2b   :  { %405 = vmatpush3.msra.mxu0 %v71_v2  ;;  %422 = vmatpush3.msra.mxu1 %v179_v5  ;;  %v173_v15 = vld [vmem:[#allocation7] sm:$0xff]  ;;  %v376_v16 = vld [vmem:[%s701_s2] ss:$0 sm:$0xff] }
  0x2c   :  { %406 = vmatprep.subr.mxu0 %v577_v0  ;;  %423 = vmatprep.subr.mxu1 %v577_v0  ;;  %v380_v29 = vld [vmem:[%s703_s4] ss:$0 sm:$0xff]  ;;  %s579_s4 = smov 96   ;;  %p531_p4 = por %p530_p3, %p529_p2 }
  0x2d   :  { %407 = vmatpush3.msra.mxu0 %v70_v3  ;;  %424 = vmatpush3.msra.mxu1 %v178_v7 }
  0x2e   :  { %408 = vmatprep.subr.mxu0 %v577_v0  ;;  %425 = vmatprep.subr.mxu1 %v577_v0  ;;  %p532_p5 = pnand %p531_p4, %p525_p1 }
  0x2f   :  { %409 = vmatpush3.msra.mxu0 %v69_v6  ;;  %426 = vmatpush3.msra.mxu1 %v177_v9 }
  0x30   :  { %411 = vmatmul.mubr.msk.f32.vlgmr.msra.gmra.mxu0 %vm80_vm1, %v66_v8  ;;  %427 = vmatprep.subr.mxu1 %v577_v0 }
  0x31   :  { %413 = vmatprep.mubr.msk.f32.mxu0 %vm578_vm0, %v577_v0  ;;  %428 = vmatpush3.msra.mxu1 %v176_v10 }
  0x32   :  { %429 = vmatprep.subr.mxu1 %v577_v0 }
  0x33   :  { %430 = vmatpush3.msra.mxu1 %v175_v13 }
  0x34   :  { %414 = vmatmul.mubr.msk.f32.gmra.mxu0 %vm80_vm1, %v67_v11  ;;  %431 = vmatprep.subr.mxu1 %v577_v0 }
  0x35   :  { %416 = vmatprep.mubr.msk.f32.mxu0 %vm578_vm0, %v577_v0  ;;  %432 = vmatpush3.msra.mxu1 %v174_v14 }
  0x36   :  { %433 = vmatprep.subr.mxu1 %v577_v0 }
  0x37   :  { %434 = vmatpush3.msra.mxu1 %v173_v15 }
  0x38   :  { %417 = vmatmul.mubr.msk.f32.gmra.mxu0 %vm80_vm1, %v68_v12 }
  0xf0   :  { %v156_v17 = vpop.f32.mrf.mxu0 }
  0xf1   :  { %v157_v18 = vadd.f32 %v376_v16, %v156_v17 }
  0xf2   :  { %v412_v19 = vpop.f32.mrf.mxu0 }
  0xf3   :  { %v170_v20 = vmax.f32 %v157_v18, 0.0 }
  0xf4   :  { %v161_v21 = vpop.f32.mrf.mxu0 }
  0xf5   :  { %v162_v22 = vadd.f32 %v376_v16, %v161_v21  ;;  %436 = vmatmul.mubr.msk.f32.vlgmr.msra.gmra.mxu1 %vm188_vm2, %v170_v20 }
  0xf6   :  { %v415_v23 = vpop.f32.mrf.mxu0  ;;  %438 = vmatprep.mubr.msk.f32.mxu1 %vm578_vm0, %v577_v0 }
  0xf7   :  { %v171_v24 = vmax.f32 %v162_v22, 0.0 }
  0xf8   :  { %v166_v25 = vpop.f32.mrf.mxu0 }
  0xf9   :  { %v167_v26 = vadd.f32 %v376_v16, %v166_v25  ;;  %439 = vmatmul.mubr.msk.f32.gmra.mxu1 %vm188_vm2, %v171_v24 }
  0xfa   :  { %v418_v27 = vpop.f32.mrf.mxu0  ;;  %441 = vmatprep.mubr.msk.f32.mxu1 %vm578_vm0, %v577_v0 }
  0xfb   :  { %v172_v28 = vmax.f32 %v167_v26, 0.0 }
  0xfd   :  { %442 = vmatmul.mubr.msk.f32.gmra.mxu1 %vm188_vm2, %v172_v28 }
 0x1b5   :  { %v264_v30 = vpop.f32.mrf.mxu1 }
 0x1b6   :  { %v265_v31 = vadd.f32 %v380_v29, %v264_v30 }
 0x1b7   :  { %v437_v32 = vpop.f32.mrf.mxu1 }
 0x1b8   :  { %v278_v33 = vmul.f32 0.5, %v265_v31  ;;  %302 = vst.msk [vmem:[#allocation9] sm:$0xff] %vm188_vm2, %v265_v31 }
 0x1b9   :  { %v269_v34 = vpop.f32.mrf.mxu1 }
 0x1ba   :  { %v281_v35 = vmul.f32 1.442695, %v278_v33  ;;  %v270_v36 = vadd.f32 %v380_v29, %v269_v34 }
 0x1bb   :  { %v440_v37 = vpop.f32.mrf.mxu1 }
 0x1bc   :  { %v279_v38 = vmul.f32 0.5, %v270_v36  ;;  %303 = vst.msk [vmem:[#allocation9 + $0x8] sm:$0xff] %vm188_vm2, %v270_v36  ;;  %v308_v39 = vsub.f32 %v265_v31, %v270_v36  ;;  %454 = vpow2.f32 %v281_v35 }
 0x1bd   :  { %v274_v40 = vpop.f32.mrf.mxu1 }
 0x1be   :  { %v283_v41 = vmul.f32 1.442695, %v279_v38  ;;  %v275_v42 = vadd.f32 %v380_v29, %v274_v40  ;;  %v309_v43 = vadd.f32 1e-06, %v308_v39 }
 0x1bf   :  { %v443_v44 = vpop.f32.mrf.mxu1 }
 0x1c0   :  { %456 = vpow2.f32 %v283_v41  ;;  %304 = vst.msk [vmem:[#allocation9 + $0x10] sm:$0xff] %vm188_vm2, %v275_v42  ;;  %v310_v45 = vmul.f32 %v309_v43, %v309_v43  ;;  %v321_v46 = vsub.f32 %v265_v31, %v275_v42  ;;  %v280_v51 = vmul.f32 0.5, %v275_v42 }
 0x1c2   :  { %v311_v47 = vsel %vm80_vm1, %v310_v45, 0.0  ;;  %v322_v48 = vadd.f32 1e-06, %v321_v46  ;;  %v285_v53 = vmul.f32 1.442695, %v280_v51 }
 0x1c3   :  { %312 = vadd.xlane.f32.xlu0 %v311_v47 }
 0x1c4   :  { %v323_v49 = vmul.f32 %v322_v48, %v322_v48  ;;  %458 = vpow2.f32 %v285_v53 }
 0x1c6   :  { %v324_v50 = vsel %vm80_vm1, %v323_v49, 0.0 }
 0x1c7   :  { %325 = vadd.xlane.f32.xlu0 %v324_v50 }
 0x1c9   :  { %v455_v52 = vpop.eup %454 }
 0x1ca   :  { %290 = vrot.lane.b32.xlu1 %v455_v52, %s579_s4 }
 0x1cd   :  { %v457_v54 = vpop.eup %456 }
 0x1ce   :  { %292 = vrot.lane.b32.xlu1 %v457_v54, %s579_s4 }
 0x1d1   :  { %v459_v55 = vpop.eup %458 }
 0x1dd   :  { %294 = vrot.lane.b32.xlu0 %v459_v55, %s579_s4 }
 0x1de   :  { %535 = shalt.err (!%p532_p5)
}
 0x1df   :  { %361 = dma.vmem_to_hbm [thread:$0]  %s356_s19, 384, %s705_s6, [#allocation10], %s574_s29, %s574_s29, %s575_s30  }
 0x1e0   :  { %s581_s23 = smov [#allocation8]  }
 0x1e1   :  { %s343_s24 = sshll.u32 %s581_s23, 4  ;;  %s344_s24 = int_to_ptr.vmem [resolvable:$true] %s343_s24 }
 0x1e2   :  { %s544_s6 = scalar_lea.vmem %s344_s24, 384  ;;  %p549_p7 = scmp.lt.s32.totalorder %s344_s24, %s344_s24 }
 0x1e3   :  { %p545_p6 = scmp.ne.s32.totalorder %s344_s24, %s544_s6  ;;  %p550_p8 = scmp.lt.s32.totalorder %s544_s6, %s544_s6 }
 0x1e5   :  { %p551_p9 = por %p550_p8, %p549_p7 }
 0x1e7   :  { %p552_p10 = pnand %p551_p9, %p545_p6 }
 0x23c   :  { %v291_v56 = vpop.permute.xlu1 %290 }
 0x23d   :  { %v299_v57 = vadd.f32 %v291_v56, %v265_v31 }
 0x23f   :  { %305 = vst.msk [vmem:[#allocation8] sm:$0xff] %vm80_vm1, %v299_v57 }
 0x240   :  { %v293_v58 = vpop.permute.xlu1 %292 }
 0x241   :  { %v300_v59 = vadd.f32 %v293_v58, %v270_v36 }
 0x243   :  { %306 = vst.msk [vmem:[#allocation8 + $0x8] sm:$0xff] %vm80_vm1, %v300_v59 }
 0x24c   :  { %v313_v60 = vpop.xlane.xlu0 %312 }
 0x24d   :  { %460 = vrsqrt.f32 %v313_v60 }
 0x250   :  { %v326_v61 = vpop.xlane.xlu0 %325 }
 0x251   :  { %462 = vrsqrt.f32 %v326_v61 }
 0x254   :  { %v295_v62 = vpop.permute.xlu0 %294 }
 0x255   :  { %v301_v63 = vadd.f32 %v295_v62, %v275_v42 }
 0x257   :  { %307 = vst.msk [vmem:[#allocation8 + $0x10] sm:$0xff] %vm80_vm1, %v301_v63 }
 0x258   :  { %555 = shalt.err (!%p552_p10)
}
 0x259   :  { %349 = dma.vmem_to_hbm [thread:$0]  %s344_s24, 384, %s704_s5, [#allocation4], %s574_s29, %s574_s29, %s575_s30   ;;  %vm316_vm3 = vcmp.eq.f32.partialorder %v313_v60, inf  ;;  %v319_v5 = vand.u32 2147483648, %v313_v60  ;;  %vm334_vm4 = vcmask 7168   ;;  %vm329_vm5 = vcmp.eq.f32.partialorder %v326_v61, inf }
 0x25a   :  { %v461_v0 = vpop.eup %460  ;;  %v332_v6 = vand.u32 2147483648, %v326_v61  ;;  %vm318_vm6 = vcmp.eq.f32.partialorder %v313_v60, 0.0  ;;  %vm336_vm7 = vcmask 15360   ;;  %vm331_vm8 = vcmp.eq.f32.partialorder %v326_v61, 0.0 }
 0x25b   :  { %v315_v1 = vmul.f32 %v461_v0, %v313_v60 }
 0x25d   :  { %v317_v3 = vsel %vm316_vm3, %v313_v60, %v315_v1 }
 0x25e   :  { %v463_v2 = vpop.eup %462  ;;  %v320_v8 = vsel %vm318_vm6, %v319_v5, %v317_v3 }
 0x25f   :  { %v328_v4 = vmul.f32 %v463_v2, %v326_v61 }
 0x261   :  { %v330_v7 = vsel %vm329_vm5, %v326_v61, %v328_v4 }
 0x262   :  { %v333_v9 = vsel %vm331_vm8, %v332_v6, %v330_v7 }
 0x263   :  { %v335_v10 = vsel %vm334_vm4, %v320_v8, %v333_v9 }
 0x264   :  { %337 = vst.msk [vmem:[%s706_s7] sm:$0xff] %vm336_vm7, %v335_v10 }
 0x265   :  { %568 = dma.done.wait [#allocation4], 384  }
 0x266   :  { %569 = vsyncadd [#allocation4], 4294966912 }
 0x267   :  { %570 = dma.done.wait [#allocation10], 384  }
 0x268   :  { %571 = vsyncadd [#allocation10], 4294966912 }
 0x269   :  { %372 = vsyncpa [#allocation3], 1 }
 0x26a   :  { %373 = vsyncpa [#allocation6], 1 }
 0x26b   :  { %374 = vsyncpa [#allocation4], 1 }
 0x26c   :  { %375 = vsyncpa [#allocation10], 1 }

</bundles_post_ra>
